<compile_context>
chip_gen: v7x
topology: tpu7x:2x2x1
jax: 0.10.0
libtpu: 0.0.40
codegen_flags: <defaults>
</compile_context>

<pallas_src>
import math
import functools

import jax
import jax.numpy as jnp
from jax.experimental import pallas as pl
from jax.experimental.pallas import tpu as pltpu


# ----------------------------------------------------------------------------
# Parameter / buffer construction (deterministic, matches torch __init__)
# ----------------------------------------------------------------------------
def make_pe_table(d_model: int, max_len: int = 512) -> jnp.ndarray:
    """Sinusoidal positional-encoding buffer, shape (max_len, d_model), f32."""
    position = jnp.arange(0, max_len, dtype=jnp.float32)[:, None]            # (L, 1)
    div_term = jnp.exp(
        jnp.arange(0, d_model, 2, dtype=jnp.float32)
        * (-(math.log(10000.0) / d_model))
    )                                                                         # (D/2,)
    pe = jnp.zeros((max_len, d_model), dtype=jnp.float32)
    pe = pe.at[:, 0::2].set(jnp.sin(position * div_term))
    pe = pe.at[:, 1::2].set(jnp.cos(position * div_term))
    return pe


# ----------------------------------------------------------------------------
# Pallas kernel: (TS, D) tile add of the PE slice (+ optional inverted dropout)
# ----------------------------------------------------------------------------
def _pe_add_kernel(seed_ref, x_ref, pe_ref, o_ref, *, dropout_p: float,
                   apply_dropout: bool):
    # x_ref / pe_ref / o_ref : (TS, D) VMEM tiles (batch dim squeezed away).
    y = x_ref[...] + pe_ref[...]

    if apply_dropout and dropout_p > 0.0:
        # Inverted dropout (training-mode nn.Dropout semantics).
        # Unique PRNG stream per (seq-tile, batch) grid point.
        s = pl.program_id(0)
        b = pl.program_id(1)
        pltpu.prng_seed(seed_ref[0] + b * pl.num_programs(0) + s)
        bits = pltpu.prng_random_bits(y.shape)
        if bits.dtype != jnp.uint32:
            bits = pltpu.bitcast(bits, jnp.uint32)          # exact reinterpret
        # keep iff bits >= p * 2^32  ->  P(keep) = 1 - p  (integer compare only)
        threshold = min(int(dropout_p * 4294967296.0), 4294967295)
        keep = bits >= jnp.uint32(threshold)
        scale = jnp.float32(1.0 / (1.0 - dropout_p))
        y = jnp.where(keep, y * scale, jnp.zeros_like(y))

    o_ref[...] = y.astype(o_ref.dtype)


# ----------------------------------------------------------------------------
# Tile sizing: keep 3 double-buffered (TS, D) streams under ~12 MiB of VMEM
# ----------------------------------------------------------------------------
def _choose_seq_tile(S: int, D: int) -> int:
    budget = 12 * 1024 * 1024
    # 3 streams (x, pe, out) x 2 buffers x D * 4 bytes per row (conservative f32)
    max_rows = max(8, (budget // (6 * D * 4)) // 8 * 8)
    if S <= max_rows:
        return S
    best = 0
    for ts in range(8, max_rows + 1, 8):   # largest multiple-of-8 divisor of S
        if S % ts == 0:
            best = ts
    return best if best > 0 else S         # fallback: whole S (rare, odd shapes)


# ----------------------------------------------------------------------------
# Wrapper
# ----------------------------------------------------------------------------
def positional_encoding_forward(x: jnp.ndarray,
                                pe_table: jnp.ndarray,
                                *,
                                dropout_p: float = 0.1,
                                training: bool = False,
                                seed: int = 0) -> jnp.ndarray:
    """x: (B, S, D).  pe_table: (max_len, D) f32.  Returns (B, S, D)."""
    B, S, D = x.shape
    assert pe_table.shape[1] == D and pe_table.shape[0] >= S

    TS = _choose_seq_tile(S, D)
    num_s_tiles = S // TS if S % TS == 0 else 1
    if num_s_tiles == 1:
        TS = S

    # Pass the full table when the block rows are tiling-legal (multiple of 8);
    # otherwise slice so the pe block equals the full array dims.
    if TS % 8 == 0:
        pe_in = pe_table
    else:
        pe_in = pe_table[:S, :]

    # Match x's dtype on bf16 inputs to halve pe HBM traffic / VMEM footprint
    # (on v5e f32 pe is equally fine since the VALU upcasts anyway).
    if x.dtype == jnp.bfloat16:
        pe_in = pe_in.astype(jnp.bfloat16)

    seed_arr = jnp.array([seed], dtype=jnp.int32)

    kernel = functools.partial(
        _pe_add_kernel,
        dropout_p=float(dropout_p),
        apply_dropout=bool(training),
    )

    return pl.pallas_call(
        kernel,
        out_shape=jax.ShapeDtypeStruct((B, S, D), x.dtype),
        grid_spec=pltpu.PrefetchScalarGridSpec(
            num_scalar_prefetch=1,                    # seed -> SMEM
            grid=(num_s_tiles, B),                    # batch innermost: pe tile stays resident
            in_specs=[
                # x: one (TS, D) tile per (s, b); leading batch dim squeezed.
                pl.BlockSpec((None, TS, D), lambda s, b, seed: (b, s, 0)),
                # pe: depends only on the sequence-tile axis -> no re-DMA over b.
                pl.BlockSpec((TS, D),       lambda s, b, seed: (s, 0)),
            ],
            out_specs=pl.BlockSpec((None, TS, D), lambda s, b, seed: (b, s, 0)),
        ),
        compiler_params=pltpu.CompilerParams(
            dimension_semantics=("parallel", "parallel"),
            vmem_limit_bytes=32 * 1024 * 1024,
        ),
    )(seed_arr, x, pe_in)


# ----------------------------------------------------------------------------
# Demo / correctness check (eval-mode forward, matching module.eval())
# ----------------------------------------------------------------------------
if __name__ == "__main__":
    B, S, D = 2, 8, 128          # D multiple of 128 -> lane-dense stores
    MAX_LEN = 512
    DROPOUT_P = 0.1

    key = jax.random.PRNGKey(0)
    x = jax.random.normal(key, (B, S, D), dtype=jnp.float32)

    pe_table = make_pe_table(D, MAX_LEN)

    # Pure-JAX reference for the eval-mode forward (dropout is identity in eval).
    ref = x + pe_table[None, :S, :]

    out = positional_encoding_forward(
        x, pe_table, dropout_p=DROPOUT_P, training=False
    )
    out = jax.block_until_ready(out)

    assert out.shape == (B, S, D)
    assert jnp.allclose(out, ref, atol=1e-6, rtol=1e-6), "mismatch vs reference"

    # Training-mode inverted dropout (integer-threshold PRNG compare, unique
    # stream per (seq-tile, batch)) is implemented in-kernel; flip
    # training=True above to exercise it (randoms differ from torch's RNG by design).

    print("KERNEL_OK")
</pallas_src>

<mosaic_0001>
module attributes {stable_mosaic.version = 11 : i64} {
  func.func @_pe_add_kernel(%arg0: i32, %arg1: i32, %arg2: memref<1xi32, #tpu.memory_space<smem>>, %arg3: memref<1x8x128xf32, #tpu.memory_space<vmem>>, %arg4: memref<8x128xf32, #tpu.memory_space<vmem>>, %arg5: memref<1x8x128xf32, #tpu.memory_space<vmem>>) attributes {dimension_semantics = [#tpu.dimension_semantics<parallel>, #tpu.dimension_semantics<parallel>], iteration_bounds = array<i64: 1, 2>, scalar_prefetch = 1 : i64, scratch_operands = 0 : i64, tpu.core_type = #tpu.core_type<tc>, window_params = [{transform_indices = @transform_0, window_bounds = array<i64: 1, 8, 128>}, {transform_indices = @transform_1, window_bounds = array<i64: 8, 128>}, {transform_indices = @transform_2, window_bounds = array<i64: 1, 8, 128>}]} {
    %c0 = arith.constant 0 : index
    %c0_0 = arith.constant 0 : index
    %c0_1 = arith.constant 0 : index
    %0 = vector.load %arg3[%c0, %c0_0, %c0_1] : memref<1x8x128xf32, #tpu.memory_space<vmem>>, vector<1x8x128xf32>
    %1 = vector.shape_cast %0 : vector<1x8x128xf32> to vector<8x128xf32>
    %c0_2 = arith.constant 0 : index
    %c0_3 = arith.constant 0 : index
    %2 = vector.load %arg4[%c0_2, %c0_3] : memref<8x128xf32, #tpu.memory_space<vmem>>, vector<8x128xf32>
    %3 = arith.addf %1, %2 : vector<8x128xf32>
    %c0_4 = arith.constant 0 : index
    %c0_5 = arith.constant 0 : index
    %c0_6 = arith.constant 0 : index
    %4 = vector.load %arg5[%c0_4, %c0_5, %c0_6] : memref<1x8x128xf32, #tpu.memory_space<vmem>>, vector<1x8x128xf32>
    %5 = vector.shape_cast %4 : vector<1x8x128xf32> to vector<8x128xf32>
    %6 = vector.shape_cast %3 : vector<8x128xf32> to vector<1x8x128xf32>
    tpu.vector_store %arg5[%c0_4, %c0_5, %c0_6], %6 {strides = array<i32>} : memref<1x8x128xf32, #tpu.memory_space<vmem>>, vector<1x8x128xf32>,
    return
  }
  func.func @transform_0(%arg0: i32, %arg1: i32, %arg2: memref<1xi32, #tpu.memory_space<smem>>) -> (i32, i32, i32) {
    %c0_i32 = arith.constant 0 : i32
    %c0_i32_0 = arith.constant 0 : i32
    return %arg1, %arg0, %c0_i32 : i32, i32, i32
  }
  func.func @transform_1(%arg0: i32, %arg1: i32, %arg2: memref<1xi32, #tpu.memory_space<smem>>) -> (i32, i32) {
    %c0_i32 = arith.constant 0 : i32
    %c0_i32_0 = arith.constant 0 : i32
    return %arg0, %c0_i32 : i32, i32
  }
  func.func @transform_2(%arg0: i32, %arg1: i32, %arg2: memref<1xi32, #tpu.memory_space<smem>>) -> (i32, i32, i32) {
    %c0_i32 = arith.constant 0 : i32
    %c0_i32_0 = arith.constant 0 : i32
    return %arg1, %arg0, %c0_i32 : i32, i32, i32
  }
}

</mosaic_0001>

<bundles_post_ra>
// kernel: tpu_custom_call.1
= control target key start
LH: loop header
LB: loop body
LE: loop exit
PB: predicated region body
PF: predicated region fallthrough
CT: control target
= control target key end

     0   :  { %9 = vsyncpa [#allocation5], 0  ;;  %s785_s0 = inlined_call_operand.<no memory space> [shape: s32[1], index: 0, kind: input, shape index: {}]   ;;  %s786_s1 = inlined_call_operand.hbm [shape: f32[2,8,128], index: 1, kind: input, shape index: {}]   ;;  %s787_s2 = inlined_call_operand.hbm [shape: f32[512,128], index: 2, kind: input, shape index: {}]   ;;  %s788_s3 = inlined_call_operand.hbm [shape: f32[2,8,128], index: 3, kind: output, shape index: {}]  }
   0x1   :  { %11 = vsyncpa [#allocation5 + $0x1], 0 }
   0x2   :  { %12 = vsyncpa [#allocation8], 0 }
   0x3   :  { %13 = vsyncpa [#allocation6], 0 }
   0x4   :  { %15 = vsyncpa [#allocation6 + $0x1], 0  ;;  %s566_s12 = smov 0   ;;  %s568_s13 = smov 0  }
   0x5   :  { %s570_s14 = smov 0   ;;  %s572_s0 = smov 0  }
   0x6   :  { %s574_s15 = smov 0   ;;  %s576_s16 = smov 0  }
   0x7 LB: > { %s309_s17 = sadd.s32 4294967295, %s541_s16   ;;  %s310_s18 = sadd.s32 4294967294, %s541_s16   ;;  %s541_s16 = sphi %s576_s16, %s21_s16   ;;  %s537_s15 = sphi %s574_s15, %s813_s15   ;;  %s533_s0 = sphi %s572_s0, %s812_s0   ;;  %s529_s14 = sphi %s570_s14, %s811_s14   ;;  %s525_s13 = sphi %s568_s13, %s810_s13   ;;  %s521_s12 = sphi %s566_s12, %s809_s12  }
   0x8   : > { %p55_p0 = scmp.ne.s32.totalorder %s525_s13, %s521_s12  ;;  %p600_p1 = scmp.eq.s32.totalorder %s309_s17, 0 }
   0x9   : > { %p604_p2 = scmp.eq.s32.totalorder %s309_s17, 1  ;;  %p113_p3 = scmp.eq.s32.totalorder %s310_s18, 1 }
   0xa   : > { %s793_s19 = scalar_select %p600_p1, 1, 0 }
   0xb   : > { %s794_s20 = scalar_select %p604_p2, 1, 0 }
   0xc   : > { %p610_p4 = por %p600_p1, %p55_p0  ;;  %p311_p5 = scmp.ge.s32.totalorder %s541_s16, 1 }
   0xd   : > { %p615_p6 = por %p113_p3, %p55_p0  ;;  %p120_p7 = scmp.lt.s32.totalorder %s541_s16, 3 }
   0xe   : > { %s795_s21 = scalar_select %p610_p4, 1, 0 }
   0xf   : > { %s796_s22 = scalar_select %p615_p6, 1, 0 }
  0x10   : > { %p620_p8 = pnand %p311_p5, %p120_p7  ;;  %s543_s24 = smov [#allocation7]  }
  0x11   : > { %s135_s25 = sshll.u32 %s543_s24, 4  ;;  %s30_s27 = sadd.s32 1, %s537_s15  ;;  %s136_s25 = int_to_ptr.vmem [resolvable:$true] %s135_s25 }
  0x12   : > { %s797_s23 = scalar_select %p620_p8, 1, 0 }
  0x13   : > { %p332_p10 = pneg %p620_p8  ;;  %s42_s28 = sadd.s32 1, %s529_s14 }
  0x14   : > { %p635_p12 = scmp.ge.s32.totalorder %s30_s27, 2  ;;  %s397_s5 = scalar_lea.hbm %s787_s2, 128 }
  0x15   : > { %p629_p11 = pnand %p332_p10, %p600_p1  ;;  %p398_p13 = scmp.ne.s32.totalorder %s787_s2, %s397_s5 }
  0x16   : > { %s799_s29 = scalar_select %p635_p12, 1, 0 }
  0x17   : > { %p399_p0 = pneg %p629_p11  ;;  %s402_s10 = scalar_lea.hbm %s787_s2, 8192 }
  0x18   : > { %p403_p7 = scmp.lt.u32.totalorder %s402_s10, %s397_s5  ;;  %p404_p10 = scmp.lt.u32.totalorder %s397_s5, %s787_s2 }
  0x19   : > { %p400_p3 = pnand %p399_p0, %p398_p13 }
  0x1a   : > { %p405_p9 = por %p404_p10, %p403_p7 }
  0x1b   : > { %p401_p5 = pneg %p400_p3 }
  0x1d   : > { %p406_p6 = pnand %p405_p9, %p401_p5 }
  0x1f   : > { %409 = shalt.err (!%p406_p6)
}
  0x20   : > { %s410_s18 = scalar_lea.vmem %s136_s25, 128  ;;  %p418_p2 = scmp.lt.s32.totalorder %s136_s25, %s136_s25 }
  0x21   : > { %p411_p1 = scmp.ne.s32.totalorder %s136_s25, %s410_s18  ;;  %p419_p12 = scmp.lt.s32.totalorder %s410_s18, %s410_s18 }
  0x23   : > { %p413_p4 = pnand %p411_p1, %p399_p0  ;;  %p420_p13 = por %p419_p12, %p418_p2 }
  0x25   : > { %p414_p8 = pneg %p413_p4 }
  0x27   : > { %p421_p3 = pnand %p420_p13, %p414_p8 }
  0x29   : > { %424 = shalt.err (!%p421_p3)
}
  0x2a   : > { %335 = dma.hbm_to_vmem [thread:$0]  (!%p629_p11), %s787_s2, 128, %s136_s25, [#allocation8]  }
  0x2b   : > { %p800_p1 = scmp.ne.s32.totalorder %s799_s29, 0  ;;  %p49_p2 = scmp.ne.s32.totalorder %s529_s14, %s525_s13 }
  0x2c   : > { %p50_p4 = scmp.eq.s32.totalorder %s541_s16, 0  ;;  %p345_p6 = scmp.lt.s32.totalorder %s541_s16, 2 }
  0x2d   : > { %s815_s27 = smov (%p800_p1, %s30_s27), 0  ;;  %p801_p12 = scmp.ne.s32.totalorder %s794_s20, 0 }
  0x2e   : > { %s37_s26 = ssub.s32 %s537_s15, %s815_s27  ;;  %p51_p9 = por %p50_p4, %p49_p2 }
  0x2f   : > { %p40_p8 = scmp.eq.s32.totalorder %s37_s26, 0  ;;  %p670_p0 = por %p801_p12, %p49_p2 }
  0x30   : > { %s146_s5 = sand.u32 1, %s529_s14   ;;  %s315_s29 = sshll.u32 %s537_s15, 7 }
  0x31   : > { %s678_s6 = scalar_select %p40_p8, %s529_s14, %s42_s28  }
  0x32   : > { %s314_s25 = sshll.u32 %s146_s5, 3  ;;  %s684_s9 = scalar_lea.hbm %s786_s1, %s315_s29 }
  0x33   : > { %s150_s20 = scalar_lea.vmem [#allocation4], %s314_s25  ;;  %p688_p11 = pnand %p345_p6, %p51_p9 }
  0x34   : > { %s158_s10 = sshll.u32 %s150_s20, 4  ;;  %s147_s28 = scalar_lea.sflag [#allocation5], %s146_s5  ;;  %s686_s10 = int_to_ptr.vmem [resolvable:$true] %s158_s10 }
  0x35   : > { %s425_s17 = scalar_lea.hbm %s684_s9, 128  ;;  %p427_p7 = pneg %p688_p11 }
  0x36   : > { %p426_p5 = scmp.ne.s32.totalorder %s684_s9, %s425_s17  ;;  %s430_s30 = scalar_lea.hbm %s786_s1, 256 }
  0x37   : > { %p431_p3 = scmp.lt.u32.totalorder %s684_s9, %s786_s1  ;;  %p432_p1 = scmp.lt.u32.totalorder %s430_s30, %s425_s17 }
  0x38   : > { %p428_p10 = pnand %p427_p7, %p426_p5  ;;  %p434_p4 = scmp.lt.u32.totalorder %s425_s17, %s684_s9 }
  0x39   : > { %p433_p2 = por %p432_p1, %p431_p3 }
  0x3a   : > { %p429_p13 = pneg %p428_p10 }
  0x3b   : > { %p435_p6 = por %p434_p4, %p433_p2 }
  0x3d   : > { %p436_p8 = pnand %p435_p6, %p429_p13 }
  0x3f   : > { %439 = shalt.err (!%p436_p8)
}
  0x40   : > { %s440_s5 = scalar_lea.vmem %s686_s10, 128  ;;  %s544_s29 = smov [#allocation4]  }
  0x41   : > { %p441_p9 = scmp.ne.s32.totalorder %s686_s10, %s440_s5  ;;  %s445_s7 = sshll.u32 %s544_s29, 4  ;;  %s446_s7 = int_to_ptr.vmem [resolvable:$false] %s445_s7 }
  0x42   : > { %s447_s8 = scalar_lea.vmem %s446_s7, 256  ;;  %p448_p10 = scmp.lt.s32.totalorder %s686_s10, %s446_s7 }
  0x43   : > { %p443_p12 = pnand %p441_p9, %p427_p7  ;;  %p449_p3 = scmp.lt.s32.totalorder %s447_s8, %s440_s5 }
  0x45   : > { %p444_p5 = pneg %p443_p12  ;;  %p450_p1 = por %p449_p3, %p448_p10 }
  0x47   : > { %p451_p2 = pnand %p450_p1, %p444_p5 }
  0x49   : > { %454 = shalt.err (!%p451_p2)
}
  0x4a   : > { %339 = dma.hbm_to_vmem [thread:$0]  (!%p688_p11), %s684_s9, 128, %s686_s10, %s147_s28  }
  0x4b   : > { %p804_p13 = scmp.ne.s32.totalorder %s797_s23, 0 }
  0x4c   : > { %s720_s20 = sand.u32 (!%p804_p13), 1, %s525_s13   ;;  %p805_p7 = scmp.ne.s32.totalorder (!%p804_p13), %s795_s21, 0 }
  0x4d   : > { %167 = sbr.rel (%p804_p13) target bundleno = 113 (0x71), region = 28  ;;  %s317_s17 = sshll.u32 (!%p804_p13), %s720_s20, 3 }
  0x4e   : > { %s170_s18 = scalar_lea.sflag (!%p804_p13), [#allocation5], %s720_s20  ;;  %s173_s24 = scalar_lea.vmem (!%p804_p13), [#allocation4], %s317_s17 }
  0x54   : > { %508 = dma.done.wait (%p805_p7), %s170_s18, 128  }
  0x55   : > { %510 = vsyncadd (%p805_p7), %s170_s18, 4294967168  ;;  %p806_p4 = scmp.ne.s32.totalorder %s793_s19, 0 }
  0x57   : > { %512 = dma.done.wait (%p806_p4), [#allocation8], 128  }
  0x58   : > { %514 = vsyncadd (%p806_p4), [#allocation8], 4294967168  ;;  %s197_s23 = scalar_lea.vmem [#allocation9], %s317_s17  ;;  %s321_s10 = sshll.u32 %s533_s0, 7  ;;  %v198_v0 = vld [vmem:[%s173_s24] sm:$0xff]  ;;  %v199_v1 = vld [vmem:[#allocation7] sm:$0xff] }
  0x59   : > { %s217_s9 = sshll.u32 %s197_s23, 4  ;;  %v200_v2 = vadd.f32 %v199_v1, %v198_v0  ;;  %s738_s28 = scalar_lea.hbm %s788_s3, %s321_s10  ;;  %s733_s9 = int_to_ptr.vmem [resolvable:$true] %s217_s9 }
  0x5a   : > { %s203_s19 = scalar_lea.sflag [#allocation6], %s720_s20  ;;  %s455_s30 = scalar_lea.vmem %s733_s9, 128 }
  0x5b   : > { %201 = vst [vmem:[%s197_s23] sm:$0xff] %v200_v2  ;;  %p456_p11 = scmp.ne.s32.totalorder %s733_s9, %s455_s30  ;;  %s545_s0 = smov [#allocation9]  }
  0x5c   : > { %s459_s26 = sshll.u32 %s545_s0, 4  ;;  %s460_s26 = int_to_ptr.vmem [resolvable:$false] %s459_s26 }
  0x5d   : > { %p457_p6 = pnand %p456_p11, %p670_p0  ;;  %s461_s25 = scalar_lea.vmem %s460_s26, 256 }
  0x5e   : > { %p462_p9 = scmp.lt.s32.totalorder %s733_s9, %s460_s26  ;;  %p463_p12 = scmp.lt.s32.totalorder %s461_s25, %s455_s30 }
  0x5f   : > { %p458_p8 = pneg %p457_p6 }
  0x60   : > { %p464_p5 = por %p463_p12, %p462_p9 }
  0x62   : > { %p465_p10 = pnand %p464_p5, %p458_p8 }
  0x64   : > { %468 = shalt.err (!%p465_p10)
}
  0x65   : > { %s469_s5 = scalar_lea.hbm %s738_s28, 128  ;;  %s473_s8 = scalar_lea.hbm %s788_s3, 256 }
  0x66   : > { %p470_p3 = scmp.ne.s32.totalorder %s738_s28, %s469_s5  ;;  %p474_p13 = scmp.lt.u32.totalorder %s738_s28, %s788_s3 }
  0x67   : > { %p475_p7 = scmp.lt.u32.totalorder %s473_s8, %s469_s5  ;;  %p477_p11 = scmp.lt.u32.totalorder %s469_s5, %s738_s28 }
  0x68   : > { %p471_p1 = pnand %p470_p3, %p670_p0 }
  0x69   : > { %p476_p4 = por %p475_p7, %p474_p13 }
  0x6a   : > { %p472_p2 = pneg %p471_p1 }
  0x6b   : > { %p478_p6 = por %p477_p11, %p476_p4 }
  0x6d   : > { %p479_p8 = pnand %p478_p6, %p472_p2 }
  0x6f   : > { %482 = shalt.err (!%p479_p8)
}
  0x70   : > { %330 = dma.vmem_to_hbm [thread:$0]  (%p670_p0), %s733_s9, 128, %s738_s28, %s203_s19  }
  0x71 PF: > { %s229_s18 = sand.u32 1, %s521_s12   ;;  %p807_p9 = scmp.ne.s32.totalorder %s796_s22, 0 }
  0x72   : > { %p808_p12 = scmp.ge.s32.totalorder %s541_s16, 2  ;;  %s230_s24 = scalar_lea.sflag [#allocation6], %s229_s18 }
  0x74   : > { %p341_p5 = pnand %p808_p12, %p807_p9 }
  0x76   : > { %516 = dma.done.wait (!%p341_p5), %s230_s24, 128  }
  0x77   : > { %518 = vsyncadd (!%p341_p5), %s230_s24, 4294967168  ;;  %s21_s16 = sadd.s32 1, %s541_s16   ;;  %s809_s12 = smov %s525_s13 }
  0x78   : > { %p18_p10 = scmp.ge.s32.totalorder %s21_s16, 4   ;;  %s810_s13 = smov %s529_s14 }
  0x79   : > { %s811_s14 = smov %s678_s6  ;;  %s812_s0 = smov %s537_s15 }
  0x7a   : > { %s813_s15 = smov %s815_s27  ;;  %20 = sbr.rel (!%p18_p10) target bundleno = 7 (0x7), region = 78 }
  0x81   :  { %235 = vsyncpa [#allocation5], 1 }
  0x82   :  { %237 = vsyncpa [#allocation5 + $0x1], 1 }
  0x83   :  { %238 = vsyncpa [#allocation8], 1 }
  0x84   :  { %239 = vsyncpa [#allocation6], 1 }
  0x85   :  { %241 = vsyncpa [#allocation6 + $0x1], 1 }

</bundles_post_ra>
